<compile_context>
chip_gen: v6e
topology: v6e:2x2x1
jax: 0.10.0
libtpu: 0.0.40
codegen_flags: <defaults>
</compile_context>

<pallas_src>
import jax
import jax.numpy as jnp
from jax.experimental import pallas as pl
from jax.experimental.pallas import tpu as pltpu

INPUT_DIM = 3
HIDDEN_DIM = 16
OUTPUT_DIM = 32
OUT_PAD = 128   # lane-dense padded output width


def _gnn_kernel(nf_ref, adj_ref, w1_ref, b1_ref, w2_ref, b2_ref, out_ref):
    gb, n, _ = nf_ref.shape                       # block_g graphs, N nodes each

    # Load and (if streamed as bf16) upcast to f32; all compute stays f32.
    nf = nf_ref[...].astype(jnp.float32)          # [Gb, N, INPUT_DIM]
    adj = adj_ref[...].astype(jnp.float32)        # [Gb, N, N]

    # Layer 1 fused across graphs: [Gb*N, 3] @ [3, 16] -> [Gb*N, 16]
    h = jnp.dot(nf.reshape(gb * n, INPUT_DIM), w1_ref[...],
                preferred_element_type=jnp.float32)
    h = jnp.maximum(h + b1_ref[...], 0.0)         # b1 (1,16) broadcasts once

    # Per-graph aggregation: adj @ h -> [Gb, N, 16]
    h = jnp.einsum('gnm,gmh->gnh', adj, h.reshape(gb, n, HIDDEN_DIM),
                   preferred_element_type=jnp.float32)

    # Layer 2 fused across graphs (output padded to 128 lanes):
    # [Gb*N, 16] @ [16, 128] -> [Gb*N, 128]
    h = jnp.dot(h.reshape(gb * n, HIDDEN_DIM), w2_ref[...],
                preferred_element_type=jnp.float32)
    h = jnp.maximum(h + b2_ref[...], 0.0)         # padded cols: relu(0+0) = 0

    # Mean over nodes -> [Gb, 128]; one full (block_g, 128) tile store.
    out_ref[...] = jnp.sum(h.reshape(gb, n, OUT_PAD), axis=1) * (1.0 / n)


def simple_gnn_forward_batched(node_features, adjacency, w1, b1, w2, b2,
                               *, block_graphs=8, bf16_io=False):
    """Batched forward over G graphs.

    node_features: [G, N, INPUT_DIM]
    adjacency    : [G, N, N]   (row-normalized recommended)
    w1: [INPUT_DIM, HIDDEN_DIM] (transposed vs. PyTorch Linear.weight), b1: [1, HIDDEN_DIM]
    w2: [HIDDEN_DIM, OUTPUT_DIM],                                        b2: [1, OUTPUT_DIM]
    Returns [G, OUTPUT_DIM] float32.
    """
    G, N, in_dim = node_features.shape
    assert in_dim == INPUT_DIM

    io_dtype = jnp.bfloat16 if bf16_io else jnp.float32
    nf = node_features.astype(io_dtype)
    adj = adjacency.astype(io_dtype)

    # Block-batch graphs; pad the graph axis so block_g divides it.
    block_g = max(1, min(block_graphs, G))
    g_pad = ((G + block_g - 1) // block_g) * block_g
    if g_pad != G:
        pad = g_pad - G
        nf = jnp.pad(nf, ((0, pad), (0, 0), (0, 0)))
        adj = jnp.pad(adj, ((0, pad), (0, 0), (0, 0)))

    # Parameters stay f32 and VMEM-resident.  Zero-pad layer-2 output width to
    # 128 lanes so the kernel's output store is a full unmasked tile.
    w1 = w1.astype(jnp.float32)
    b1 = b1.reshape(1, HIDDEN_DIM).astype(jnp.float32)
    w2p = jnp.zeros((HIDDEN_DIM, OUT_PAD), jnp.float32).at[:, :OUTPUT_DIM].set(
        w2.astype(jnp.float32))
    b2p = jnp.zeros((1, OUT_PAD), jnp.float32).at[:, :OUTPUT_DIM].set(
        b2.reshape(1, OUTPUT_DIM).astype(jnp.float32))

    out = pl.pallas_call(
        _gnn_kernel,
        out_shape=jax.ShapeDtypeStruct((g_pad, OUT_PAD), jnp.float32),
        grid_spec=pltpu.PrefetchScalarGridSpec(
            num_scalar_prefetch=0,
            grid=(g_pad // block_g,),
            in_specs=[
                pl.BlockSpec((block_g, N, INPUT_DIM), lambda g: (g, 0, 0)),
                pl.BlockSpec((block_g, N, N), lambda g: (g, 0, 0)),
                # Weights/biases: constant block index -> resident across grid.
                pl.BlockSpec((INPUT_DIM, HIDDEN_DIM), lambda g: (0, 0)),
                pl.BlockSpec((1, HIDDEN_DIM), lambda g: (0, 0)),
                pl.BlockSpec((HIDDEN_DIM, OUT_PAD), lambda g: (0, 0)),
                pl.BlockSpec((1, OUT_PAD), lambda g: (0, 0)),
            ],
            out_specs=pl.BlockSpec((block_g, OUT_PAD), lambda g: (g, 0)),
        ),
        compiler_params=pltpu.CompilerParams(
            dimension_semantics=("parallel",)),
    )(nf, adj, w1, b1, w2p, b2p)

    return out[:G, :OUTPUT_DIM]                   # [G, OUTPUT_DIM]


def simple_gnn_forward(node_features, adjacency, w1, b1, w2, b2):
    """Single-graph forward matching the PyTorch module: returns [OUTPUT_DIM]."""
    out = simple_gnn_forward_batched(node_features[None], adjacency[None],
                                     w1, b1, w2, b2)
    return out[0]


def _reference_single(nf, adj, w1, b1, w2, b2):
    h = jax.nn.relu(nf @ w1 + b1)
    h = adj @ h
    h = jax.nn.relu(h @ w2 + b2)
    return jnp.mean(h, axis=0)


if __name__ == "__main__":
    key = jax.random.PRNGKey(0)
    k_nf, k_adj, k_w1, k_b1, k_w2, k_b2 = jax.random.split(key, 6)

    num_graphs = 16
    num_nodes = 8

    node_features = jax.random.normal(
        k_nf, (num_graphs, num_nodes, INPUT_DIM), jnp.float32)

    # Row-normalized adjacency with self-loops, per graph ("normalized recommended").
    adj_raw = (jax.random.uniform(k_adj, (num_graphs, num_nodes, num_nodes)) > 0.5
               ).astype(jnp.float32)
    adj_raw = adj_raw + jnp.eye(num_nodes, dtype=jnp.float32)[None]
    adjacency = adj_raw / jnp.sum(adj_raw, axis=-1, keepdims=True)

    # Parameters (PyTorch Linear weight [out,in] stored pre-transposed as [in,out]).
    w1 = 0.1 * jax.random.normal(k_w1, (INPUT_DIM, HIDDEN_DIM), jnp.float32)
    b1 = 0.1 * jax.random.normal(k_b1, (1, HIDDEN_DIM), jnp.float32)
    w2 = 0.1 * jax.random.normal(k_w2, (HIDDEN_DIM, OUTPUT_DIM), jnp.float32)
    b2 = 0.1 * jax.random.normal(k_b2, (1, OUTPUT_DIM), jnp.float32)

    ref_batched = jax.vmap(_reference_single, in_axes=(0, 0, None, None, None, None))(
        node_features, adjacency, w1, b1, w2, b2)

    # Batched path (f32 I/O): 2 grid steps of 8 graphs each.
    out_batched = simple_gnn_forward_batched(node_features, adjacency, w1, b1, w2, b2)
    out_batched = jax.block_until_ready(out_batched)
    assert out_batched.shape == (num_graphs, OUTPUT_DIM), out_batched.shape
    assert jnp.allclose(out_batched, ref_batched, atol=1e-5, rtol=1e-5)

    # Batched path with bf16 HBM streaming (compute stays f32): looser tolerance.
    out_bf16 = simple_gnn_forward_batched(node_features, adjacency, w1, b1, w2, b2,
                                          bf16_io=True)
    out_bf16 = jax.block_until_ready(out_bf16)
    assert jnp.allclose(out_bf16, ref_batched, atol=2e-2, rtol=2e-2)

    # Single-graph path (original module semantics: returns [OUTPUT_DIM]).
    out_single = simple_gnn_forward(node_features[0], adjacency[0], w1, b1, w2, b2)
    out_single = jax.block_until_ready(out_single)
    ref_single = _reference_single(node_features[0], adjacency[0], w1, b1, w2, b2)
    assert out_single.shape == (OUTPUT_DIM,), out_single.shape
    assert jnp.allclose(out_single, ref_single, atol=1e-5, rtol=1e-5)

    print("KERNEL_OK")
</pallas_src>

<mosaic_0001>
module attributes {stable_mosaic.version = 11 : i64} {
  func.func @_gnn_kernel(%arg0: i32, %arg1: memref<8x8x3xf32, #tpu.memory_space<vmem>>, %arg2: memref<8x8x8xf32, #tpu.memory_space<vmem>>, %arg3: memref<3x16xf32, #tpu.memory_space<vmem>>, %arg4: memref<1x16xf32, #tpu.memory_space<vmem>>, %arg5: memref<16x128xf32, #tpu.memory_space<vmem>>, %arg6: memref<1x128xf32, #tpu.memory_space<vmem>>, %arg7: memref<8x128xf32, #tpu.memory_space<vmem>>) attributes {dimension_semantics = [#tpu.dimension_semantics<parallel>], iteration_bounds = array<i64: 2>, scalar_prefetch = 0 : i64, scratch_operands = 0 : i64, tpu.core_type = #tpu.core_type<tc>, window_params = [{transform_indices = @transform_0, window_bounds = array<i64: 8, 8, 3>}, {transform_indices = @transform_1, window_bounds = array<i64: 8, 8, 8>}, {pipeline_mode = #tpu.pipeline_mode<synchronous>, transform_indices = @transform_2, window_bounds = array<i64: 3, 16>}, {pipeline_mode = #tpu.pipeline_mode<synchronous>, transform_indices = @transform_3, window_bounds = array<i64: 1, 16>}, {pipeline_mode = #tpu.pipeline_mode<synchronous>, transform_indices = @transform_4, window_bounds = array<i64: 16, 128>}, {pipeline_mode = #tpu.pipeline_mode<synchronous>, transform_indices = @transform_5, window_bounds = array<i64: 1, 128>}, {transform_indices = @transform_6, window_bounds = array<i64: 8, 128>}]} {
    %c0 = arith.constant 0 : index
    %c0_0 = arith.constant 0 : index
    %c0_1 = arith.constant 0 : index
    %0 = vector.load %arg1[%c0, %c0_0, %c0_1] : memref<8x8x3xf32, #tpu.memory_space<vmem>>, vector<8x8x3xf32>
    %c0_2 = arith.constant 0 : index
    %c0_3 = arith.constant 0 : index
    %c0_4 = arith.constant 0 : index
    %1 = vector.load %arg2[%c0_2, %c0_3, %c0_4] : memref<8x8x8xf32, #tpu.memory_space<vmem>>, vector<8x8x8xf32>
    %2 = vector.shape_cast %0 : vector<8x8x3xf32> to vector<64x3xf32>
    %c0_5 = arith.constant 0 : index
    %c0_6 = arith.constant 0 : index
    %3 = vector.load %arg3[%c0_5, %c0_6] : memref<3x16xf32, #tpu.memory_space<vmem>>, vector<3x16xf32>
    %cst = arith.constant dense<0.000000e+00> : vector<64x16xf32>
    %4 = tpu.matmul %2, %3, %cst {dimension_numbers = #tpu.dot_dimension_numbers<[1], [0], [0], [1], [0, 0, 1, 1], [], []>} : vector<64x3xf32>, vector<3x16xf32>, vector<64x16xf32> -> vector<64x16xf32>
    %c0_7 = arith.constant 0 : index
    %c0_8 = arith.constant 0 : index
    %5 = vector.load %arg4[%c0_7, %c0_8] : memref<1x16xf32, #tpu.memory_space<vmem>>, vector<1x16xf32>
    %6 = vector.broadcast %5 : vector<1x16xf32> to vector<64x16xf32>
    %7 = arith.addf %4, %6 : vector<64x16xf32>
    %cst_9 = arith.constant 0.000000e+00 : f32
    %8 = vector.broadcast %cst_9 : f32 to vector<64x16xf32>
    %9 = arith.maximumf %7, %8 : vector<64x16xf32>
    %10 = vector.shape_cast %9 : vector<64x16xf32> to vector<8x8x16xf32>
    "tpu.trace_start"() <{level = 10 : i32, message = "gnm,gmh->gnh"}> : () -> ()
    %cst_10 = arith.constant dense<0.000000e+00> : vector<8x8x16xf32>
    %11 = tpu.matmul %1, %10, %cst_10 {dimension_numbers = #tpu.dot_dimension_numbers<[2], [1], [1], [2], [0, 0, 0, 1, 1, 2], [0], [0]>} : vector<8x8x8xf32>, vector<8x8x16xf32>, vector<8x8x16xf32> -> vector<8x8x16xf32>
    "tpu.trace_stop"() : () -> ()
    %12 = vector.shape_cast %11 : vector<8x8x16xf32> to vector<64x16xf32>
    %c0_11 = arith.constant 0 : index
    %c0_12 = arith.constant 0 : index
    %13 = vector.load %arg5[%c0_11, %c0_12] : memref<16x128xf32, #tpu.memory_space<vmem>>, vector<16x128xf32>
    %cst_13 = arith.constant dense<0.000000e+00> : vector<64x128xf32>
    %14 = tpu.matmul %12, %13, %cst_13 {dimension_numbers = #tpu.dot_dimension_numbers<[1], [0], [0], [1], [0, 0, 1, 1], [], []>} : vector<64x16xf32>, vector<16x128xf32>, vector<64x128xf32> -> vector<64x128xf32>
    %c0_14 = arith.constant 0 : index
    %c0_15 = arith.constant 0 : index
    %15 = vector.load %arg6[%c0_14, %c0_15] : memref<1x128xf32, #tpu.memory_space<vmem>>, vector<1x128xf32>
    %16 = vector.broadcast %15 : vector<1x128xf32> to vector<64x128xf32>
    %17 = arith.addf %14, %16 : vector<64x128xf32>
    %cst_16 = arith.constant 0.000000e+00 : f32
    %18 = vector.broadcast %cst_16 : f32 to vector<64x128xf32>
    %19 = arith.maximumf %17, %18 : vector<64x128xf32>
    %20 = vector.shape_cast %19 : vector<64x128xf32> to vector<8x8x128xf32>
    %cst_17 = arith.constant dense<0.000000e+00> : vector<8x128xf32>
    %21 = vector.multi_reduction <add>, %20, %cst_17 [1] : vector<8x8x128xf32> to vector<8x128xf32>
    %cst_18 = arith.constant 1.250000e-01 : f32
    %22 = vector.broadcast %cst_18 : f32 to vector<8x128xf32>
    %23 = arith.mulf %21, %22 : vector<8x128xf32>
    %c0_19 = arith.constant 0 : index
    %c0_20 = arith.constant 0 : index
    %24 = vector.load %arg7[%c0_19, %c0_20] : memref<8x128xf32, #tpu.memory_space<vmem>>, vector<8x128xf32>
    tpu.vector_store %arg7[%c0_19, %c0_20], %23 {strides = array<i32>} : memref<8x128xf32, #tpu.memory_space<vmem>>, vector<8x128xf32>,
    return
  }
  func.func @transform_0(%arg0: i32) -> (i32, i32, i32) {
    %c0_i32 = arith.constant 0 : i32
    %c0_i32_0 = arith.constant 0 : i32
    %c0_i32_1 = arith.constant 0 : i32
    return %arg0, %c0_i32, %c0_i32_0 : i32, i32, i32
  }
  func.func @transform_1(%arg0: i32) -> (i32, i32, i32) {
    %c0_i32 = arith.constant 0 : i32
    %c0_i32_0 = arith.constant 0 : i32
    %c0_i32_1 = arith.constant 0 : i32
    return %arg0, %c0_i32, %c0_i32_0 : i32, i32, i32
  }
  func.func @transform_2(%arg0: i32) -> (i32, i32) {
    %c0_i32 = arith.constant 0 : i32
    %c0_i32_0 = arith.constant 0 : i32
    %c0_i32_1 = arith.constant 0 : i32
    return %c0_i32, %c0_i32_0 : i32, i32
  }
  func.func @transform_3(%arg0: i32) -> (i32, i32) {
    %c0_i32 = arith.constant 0 : i32
    %c0_i32_0 = arith.constant 0 : i32
    %c0_i32_1 = arith.constant 0 : i32
    return %c0_i32, %c0_i32_0 : i32, i32
  }
  func.func @transform_4(%arg0: i32) -> (i32, i32) {
    %c0_i32 = arith.constant 0 : i32
    %c0_i32_0 = arith.constant 0 : i32
    %c0_i32_1 = arith.constant 0 : i32
    return %c0_i32, %c0_i32_0 : i32, i32
  }
  func.func @transform_5(%arg0: i32) -> (i32, i32) {
    %c0_i32 = arith.constant 0 : i32
    %c0_i32_0 = arith.constant 0 : i32
    %c0_i32_1 = arith.constant 0 : i32
    return %c0_i32, %c0_i32_0 : i32, i32
  }
  func.func @transform_6(%arg0: i32) -> (i32, i32) {
    %c0_i32 = arith.constant 0 : i32
    %c0_i32_0 = arith.constant 0 : i32
    return %arg0, %c0_i32 : i32, i32
  }
}

</mosaic_0001>

<bundles_post_ra>
// kernel: tpu_custom_call.1
= control target key start
LH: loop header
LB: loop body
LE: loop exit
PB: predicated region body
PF: predicated region fallthrough
CT: control target
= control target key end

     0   :  { %11 = vsyncpa [#allocation3], 0  ;;  %s1803_s0 = inlined_call_operand.vmem [shape: f32[16,8,3], index: 0, kind: input, shape index: {}]   ;;  %s1804_s1 = inlined_call_operand.vmem [shape: f32[16,8,8], index: 1, kind: input, shape index: {}]   ;;  %s1805_s2 = inlined_call_operand.vmem [shape: f32[3,16], index: 2, kind: input, shape index: {}]   ;;  %s1806_s3 = inlined_call_operand.vmem [shape: f32[1,16], index: 3, kind: input, shape index: {}]   ;;  %s1807_s4 = inlined_call_operand.vmem [shape: f32[16,128], index: 4, kind: input, shape index: {}]   ;;  %s1808_s5 = inlined_call_operand.vmem [shape: f32[1,128], index: 5, kind: input, shape index: {}]   ;;  %s1809_s6 = inlined_call_operand.hbm [shape: f32[16,128], index: 6, kind: output, shape index: {}]  }
   0x1   :  { %13 = vsyncpa [#allocation3 + $0x1], 0  ;;  %s1625_s21 = smov 0   ;;  %s1627_s22 = smov 0  }
   0x2   :  { %s1629_s23 = smov 0   ;;  %s1631_s24 = smov 0  }
   0x3 LB: > { %s1646_s25 = sadd.s32 4294967295, %s1585_s24   ;;  %s1337_s26 = sadd.s32 4294967294, %s1585_s24   ;;  %s1585_s24 = sphi %s1631_s24, %s1815_s24   ;;  %s1581_s23 = sphi %s1629_s23, %s1814_s23   ;;  %s1577_s22 = sphi %s1627_s22, %s1813_s22   ;;  %s1573_s21 = sphi %s1625_s21, %s1812_s21  }
   0x4   : > { %s1650_s27 = sadd.s32 1, %s1585_s24   ;;  %s162_s28 = sadd.s32 1, %s1581_s23 }
   0x5   : > { %s159_s29 = ssub.s32 %s1585_s24, %s1650_s27  ;;  %p172_p0 = scmp.ne.s32.totalorder %s1581_s23, %s1577_s22 }
   0x6   : > { %p160_p1 = scmp.eq.s32.totalorder %s159_s29, 0  ;;  %p173_p2 = scmp.eq.s32.totalorder %s1646_s25, 1 }
   0x7   : > { %p178_p3 = scmp.ne.s32.totalorder %s1577_s22, %s1573_s21  ;;  %p179_p4 = scmp.eq.s32.totalorder %s1337_s26, 1 }
   0x8   : > { %s1661_s30 = scalar_select %p160_p1, %s1581_s23, %s162_s28  }
   0x9   : > { %p1663_p5 = por %p173_p2, %p172_p0  ;;  %p1667_p6 = por %p179_p4, %p178_p3 }
   0xa   : > { %p1340_p7 = scmp.ge.s32.totalorder %s1585_s24, 1  ;;  %p227_p8 = scmp.lt.s32.totalorder %s1585_s24, 3 }
   0xc   : > { %p228_p9 = pnand %p1340_p7, %p227_p8 }
   0xd   : > { %s1342_s11 = sshll.u32 (!%p228_p9), %s1646_s25, 3  ;;  %s1374_s14 = sshll.u32 (!%p228_p9), %s1646_s25, 7 }
   0xe   : > { %231 = sbr.rel (%p228_p9) target bundleno = 665 (0x299), region = 44  ;;  %p263_p10 = scmp.lt.s32.totalorder (!%p228_p9), %s1342_s11, 15 }
   0xf   : > { %s1766_s19 = scalar_lea.hbm (!%p228_p9), %s1809_s6, %s1374_s14  ;;  %s1589_s25 = smov (!%p228_p9), [#allocation2]  }
  0x10   : > { %s1529_s28 = sshll.u32 (!%p228_p9), %s1589_s25, 4  ;;  %s1530_s28 = int_to_ptr.vmem [resolvable:$false] %s1529_s28 }
  0x11   : > { %s1531_s29 = scalar_lea.vmem (!%p228_p9), %s1530_s28, 256 }
  0x13   : > { %v290_v0 = vld [vmem:[%s1805_s2] sm:$0x7]  ;;  %vm323_vm0 = vcmask 1042432   ;;  %s1817_s11 = smov (!%p263_p10, %s1342_s11), 15  ;;  %vm298_vm1 = vcmask 23552   ;;  %v1587_v9 = vmov 0.0  }
  0x14   : > { %1412 = vmatprep.subr.msk.mxu0 %vm323_vm0, %v290_v0  ;;  %1482 = vmatprep.subr.msk.mxu1 %vm323_vm0, %v290_v0  ;;  %s1343_s12 = sshll.u32 %s1817_s11, 3  ;;  %vm1588_vm2 = vmmov 0   ;;  %v1346_v11 = vld [vmem:[%s1806_s3] ss:$0 sm:$0xff]  ;;  %vm440_vm3 = vcmask 64512   ;;  %v1026_v43 = vld [vmem:[%s1807_s4 + $0x8] sm:$0xff] }
  0x15   : > { %1413 = vmatpush3.msk.msra.mxu0 %vm323_vm0, %v290_v0  ;;  %1483 = vmatpush3.msk.msra.mxu1 %vm323_vm0, %v290_v0  ;;  %s266_s15 = scalar_lea.vmem %s1803_s0, %s1343_s12  ;;  %s1703_s20 = scalar_lea.vmem %s1804_s1, %s1343_s12  ;;  %v1025_v44 = vld [vmem:[%s1807_s4] sm:$0xff]  ;;  %vm1034_vm4 = vcmask 130048   ;;  %vm1236_vm5 = vcmask 1041409   ;;  %vm1238_vm6 = vcmask 1042434   ;;  %vm1240_vm7 = vcmask 1043459  }
  0x16   : > { %v274_v1 = vld [vmem:[%s266_s15] sm:$0xff]  ;;  %v275_v2 = vld [vmem:[%s266_s15 + $0x8] sm:$0xff]  ;;  %v276_v3 = vld [vmem:[%s266_s15 + $0x10] sm:$0xff]  ;;  %1426 = vmatprep.subr.mxu1 %v1587_v9  ;;  %1446 = vmatprep.subr.mxu0 %v1587_v9  ;;  %s259_s12 = sand.u32 1, %s1577_s22   ;;  %vm1242_vm8 = vcmask 1044484   ;;  %vm1244_vm9 = vcmask 1045509  }
  0x17   : > { %1414 = vmatprep.mubr.msk.f32.mxu0 %vm298_vm1, %v274_v1  ;;  %v278_v4 = vld [vmem:[%s266_s15 + $0x20] sm:$0xff]  ;;  %v279_v5 = vld [vmem:[%s266_s15 + $0x28] sm:$0xff]  ;;  %v280_v6 = vld [vmem:[%s266_s15 + $0x30] sm:$0xff]  ;;  %s1759_s13 = sshll.u32 %s259_s12, 3  ;;  %vm1246_vm10 = vcmask 1046534   ;;  %vm1248_vm11 = vcmask 1047559  }
  0x18   : > { %1415 = vmatmul.mubr.msk.f32.vlgmr.msra.gmra.mxu0 %vm298_vm1, %v275_v2  ;;  %1420 = vmatprep.mubr.msk.f32.mxu1 %vm298_vm1, %v278_v4  ;;  %v277_v7 = vld [vmem:[%s266_s15 + $0x18] sm:$0xff]  ;;  %v282_v20 = vld [vmem:[%s1703_s20] sm:$0xff]  ;;  %v283_v30 = vld [vmem:[%s1703_s20 + $0x8] sm:$0xff] }
  0x19   : > { %1417 = vmatprep.mubr.msk.f32.mxu0 %vm298_vm1, %v276_v3  ;;  %1421 = vmatmul.mubr.msk.f32.vlgmr.msra.gmra.mxu1 %vm298_vm1, %v279_v5  ;;  %v281_v8 = vld [vmem:[%s266_s15 + $0x38] sm:$0xff]  ;;  %v286_v28 = vld [vmem:[%s1703_s20 + $0x20] sm:$0xff]  ;;  %v288_v33 = vld [vmem:[%s1703_s20 + $0x30] sm:$0xff]  ;;  %s261_s15 = scalar_lea.vmem [#allocation2], %s1759_s13 }
  0x1a   : > { %1423 = vmatprep.mubr.msk.f32.mxu1 %vm298_vm1, %v280_v6  ;;  %v284_v35 = vld [vmem:[%s1703_s20 + $0x10] sm:$0xff]  ;;  %v285_v39 = vld [vmem:[%s1703_s20 + $0x18] sm:$0xff]  ;;  %v287_v41 = vld [vmem:[%s1703_s20 + $0x28] sm:$0xff]  ;;  %s1266_s16 = sshll.u32 %s261_s15, 4  ;;  %s1267_s16 = int_to_ptr.vmem [resolvable:$true] %s1266_s16 }
  0x1b   : > { %v289_v42 = vld [vmem:[%s1703_s20 + $0x38] sm:$0xff]  ;;  %v1364_v61 = vld [vmem:[%s1808_s5] ss:$0 sm:$0xff]  ;;  %s1253_s20 = scalar_lea.sflag [#allocation3], %s259_s12  ;;  %s1525_s26 = scalar_lea.vmem %s1267_s16, 128 }
  0x1c   : > { %1418 = vmatmul.mubr.msk.f32.gmra.mxu0 %vm298_vm1, %v277_v7  ;;  %p1526_p11 = scmp.ne.s32.totalorder %s1267_s16, %s1525_s26  ;;  %p1532_p0 = scmp.lt.s32.totalorder %s1267_s16, %s1530_s28 }
  0x1d   : > { %1424 = vmatmul.mubr.msk.f32.gmra.mxu1 %vm298_vm1, %v281_v8  ;;  %1448 = vmatprep.mubr.msk.f32.mxu0 %vm1588_vm2, %v1587_v9  ;;  %p1533_p1 = scmp.lt.s32.totalorder %s1531_s29, %s1525_s26 }
  0x1e   : > { %1428 = vmatprep.mubr.msk.f32.mxu1 %vm1588_vm2, %v1587_v9  ;;  %p1527_p12 = pnand %p1526_p11, %p1663_p5 }
  0x1f   : > { %p1534_p2 = por %p1533_p1, %p1532_p0 }
  0x20   : > { %p1528_p13 = pneg %p1527_p12 }
  0x22   : > { %p1535_p3 = pnand %p1534_p2, %p1528_p13 }
  0xd8   : > { %v1416_v10 = vpop.f32.mrf.mxu0 }
  0xd9   : > { %v1422_v12 = vpop.f32.mrf.mxu1  ;;  %v399_v14 = vadd.f32 %v1416_v10, %v1346_v11 }
  0xda   : > { %v393_v13 = vpop.f32.mrf.mxu0  ;;  %v419_v34 = vadd.f32 %v1422_v12, %v1346_v11 }
  0xdb   : > { %v394_v15 = vadd.f32 %v1346_v11, %v393_v13  ;;  %v413_v16 = vpop.f32.mrf.mxu1  ;;  %v433_v24 = vmax.f32 %v399_v14, 0.0 }
  0xdc   : > { %v1419_v17 = vpop.f32.mrf.mxu0  ;;  %v414_v18 = vadd.f32 %v1346_v11, %v413_v16  ;;  %v437_v37 = vmax.f32 %v419_v34, 0.0 }
  0xdd   : > { %v432_v19 = vmax.f32 %v394_v15, 0.0  ;;  %v1425_v21 = vpop.f32.mrf.mxu1  ;;  %v409_v32 = vadd.f32 %v1419_v17, %v1346_v11 }
  0xde   : > { %v403_v22 = vpop.f32.mrf.mxu0  ;;  %v436_v23 = vmax.f32 %v414_v18, 0.0  ;;  %v429_v38 = vadd.f32 %v1425_v21, %v1346_v11 }
  0xdf   : > { %1427 = vmatpush3.msra.mxu1 %v432_v19  ;;  %v404_v25 = vadd.f32 %v1346_v11, %v403_v22  ;;  %v423_v26 = vpop.f32.mrf.mxu1  ;;  %v435_v36 = vmax.f32 %v409_v32, 0.0 }
  0xe0   : > { %1429 = vmatmul.mubr.msk.f32.vlgmr.msra.gmra.mxu1 %vm440_vm3, %v282_v20  ;;  %1431 = vmatprep.subr.mxu1 %v1587_v9  ;;  %v424_v27 = vadd.f32 %v1346_v11, %v423_v26  ;;  %v439_v40 = vmax.f32 %v429_v38, 0.0 }
  0xe1   : > { %1432 = vmatpush3.msra.mxu1 %v433_v24  ;;  %v434_v29 = vmax.f32 %v404_v25, 0.0  ;;  %1433 = vmatprep.mubr.msk.f32.mxu1 %vm1588_vm2, %v1587_v9 }
  0xe2   : > { %1436 = vmatprep.subr.mxu1 %v1587_v9  ;;  %1447 = vmatpush3.msra.mxu0 %v436_v23  ;;  %v438_v31 = vmax.f32 %v424_v27, 0.0 }
  0xe3   : > { %1449 = vmatmul.mubr.msk.f32.vlgmr.msra.gmra.mxu0 %vm440_vm3, %v286_v28  ;;  %1456 = vmatprep.subr.mxu0 %v1587_v9 }
  0xe4   : > { %1434 = vmatmul.mubr.msk.f32.vlgmr.msra.gmra.mxu1 %vm440_vm3, %v283_v30  ;;  %1457 = vmatpush3.msra.mxu0 %v438_v31 }
  0xe5   : > { %1437 = vmatpush3.msra.mxu1 %v434_v29  ;;  %1438 = vmatprep.mubr.msk.f32.mxu1 %vm1588_vm2, %v1587_v9 }
  0xe6   : > { %1441 = vmatprep.subr.mxu1 %v1587_v9  ;;  %1458 = vmatprep.mubr.msk.f32.mxu0 %vm1588_vm2, %v1587_v9 }
  0xe7   : > { %1459 = vmatmul.mubr.msk.f32.vlgmr.msra.gmra.mxu0 %vm440_vm3, %v288_v33  ;;  %1466 = vmatprep.subr.mxu0 %v1026_v43 }
  0xe8   : > { %1439 = vmatmul.mubr.msk.f32.vlgmr.msra.gmra.mxu1 %vm440_vm3, %v284_v35  ;;  %1467 = vmatpush3.msra.mxu0 %v1026_v43 }
  0xe9   : > { %1442 = vmatpush3.msra.mxu1 %v435_v36  ;;  %1443 = vmatprep.mubr.msk.f32.mxu1 %vm1588_vm2, %v1587_v9 }
  0xea   : > { %1451 = vmatprep.subr.mxu1 %v1587_v9  ;;  %1468 = vmatprep.subr.mxu0 %v1025_v44 }
  0xeb   : > { %1469 = vmatpush3.msra.mxu0 %v1025_v44 }
  0xec   : > { %1444 = vmatmul.mubr.msk.f32.vlgmr.msra.gmra.mxu1 %vm440_vm3, %v285_v39 }
  0xed   : > { %1452 = vmatpush3.msra.mxu1 %v437_v37  ;;  %1453 = vmatprep.mubr.msk.f32.mxu1 %vm1588_vm2, %v1587_v9 }
  0xee   : > { %1461 = vmatprep.subr.mxu1 %v1587_v9 }
  0xf0   : > { %1454 = vmatmul.mubr.msk.f32.vlgmr.msra.gmra.mxu1 %vm440_vm3, %v287_v41 }
  0xf1   : > { %1462 = vmatpush3.msra.mxu1 %v439_v40  ;;  %1463 = vmatprep.mubr.msk.f32.mxu1 %vm1588_vm2, %v1587_v9 }
  0xf4   : > { %1464 = vmatmul.mubr.msk.f32.vlgmr.msra.gmra.mxu1 %vm440_vm3, %v289_v42 }
 0x1a0   : > { %v510_v45 = vpop.f32.mrf.mxu1 }
 0x1a1   : > { %1470 = vmatprep.mubr.msk.f32.mxu0 %vm1034_vm4, %v510_v45 }
 0x1a2   : > { %v1430_v46 = vpop.f32.mrf.mxu1 }
 0x1a3   : > { %v802_v47 = vpop.f32.mrf.mxu0 }
 0x1a4   : > { %v583_v48 = vpop.f32.mrf.mxu1 }
 0x1a5   : > { %1471 = vmatmul.mubr.msk.f32.vlgmr.msra.gmra.mxu0 %vm1034_vm4, %v583_v48  ;;  %v1450_v49 = vpop.f32.mrf.mxu0 }
 0x1a6   : > { %v1435_v50 = vpop.f32.mrf.mxu1 }
 0x1a7   : > { %v948_v51 = vpop.f32.mrf.mxu0 }
 0x1a8   : > { %v656_v52 = vpop.f32.mrf.mxu1 }
 0x1a9   : > { %1473 = vmatprep.mubr.msk.f32.mxu0 %vm1034_vm4, %v656_v52  ;;  %v1460_v53 = vpop.f32.mrf.mxu0 }
 0x1aa   : > { %v1440_v54 = vpop.f32.mrf.mxu1 }
 0x1ac   : > { %v729_v55 = vpop.f32.mrf.mxu1 }
 0x1ad   : > { %1474 = vmatmul.mubr.msk.f32.gmra.mxu0 %vm1034_vm4, %v729_v55 }
 0x1ae   : > { %v1445_v56 = vpop.f32.mrf.mxu1  ;;  %1476 = vmatprep.mubr.msk.f32.mxu0 %vm1034_vm4, %v802_v47 }
 0x1b0   : > { %v875_v57 = vpop.f32.mrf.mxu1 }
 0x1b1   : > { %1477 = vmatmul.mubr.msk.f32.gmra.mxu0 %vm1034_vm4, %v875_v57 }
 0x1b2   : > { %v1455_v58 = vpop.f32.mrf.mxu1  ;;  %1479 = vmatprep.mubr.msk.f32.mxu0 %vm1034_vm4, %v948_v51 }
 0x1b4   : > { %v1021_v59 = vpop.f32.mrf.mxu1 }
 0x1b5   : > { %1480 = vmatmul.mubr.msk.f32.gmra.mxu0 %vm1034_vm4, %v1021_v59 }
 0x1b6   : > { %v1465_v60 = vpop.f32.mrf.mxu1 }
 0x265   : > { %v1472_v62 = vpop.f32.mrf.mxu0 }
 0x266   : > { %v1131_v63 = vadd.f32 %v1472_v62, %v1364_v61 }
 0x267   : > { %v1125_v0 = vpop.f32.mrf.mxu0 }
 0x268   : > { %v1165_v1 = vmax.f32 %v1131_v63, 0.0  ;;  %v1126_v2 = vadd.f32 %v1364_v61, %v1125_v0 }
 0x26a   : > { %v1178_v3 = vrot.slane %v1165_v1, 4  ;;  %v1164_v4 = vmax.f32 %v1126_v2, 0.0 }
 0x26c   : > { %v1179_v5 = vadd.f32 %v1178_v3, %v1165_v1  ;;  %v1172_v6 = vrot.slane %v1164_v4, 4 }
 0x26d   : > { %v1475_v7 = vpop.f32.mrf.mxu0 }
 0x26e   : > { %v1173_v8 = vadd.f32 %v1172_v6, %v1164_v4  ;;  %v1141_v9 = vadd.f32 %v1475_v7, %v1364_v61  ;;  %v1180_v11 = vrot.slane %v1179_v5, 2 }
 0x26f   : > { %v1135_v10 = vpop.f32.mrf.mxu0 }
 0x270   : > { %v1174_v12 = vrot.slane %v1173_v8, 2  ;;  %v1167_v13 = vmax.f32 %v1141_v9, 0.0  ;;  %v1136_v14 = vadd.f32 %v1364_v61, %v1135_v10  ;;  %v1181_v21 = vadd.f32 %v1180_v11, %v1179_v5 }
 0x271   : > { %v1478_v15 = vpop.f32.mrf.mxu0 }
 0x272   : > { %v1175_v16 = vadd.f32 %v1174_v12, %v1173_v8  ;;  %v1190_v17 = vrot.slane %v1167_v13, 4  ;;  %v1166_v18 = vmax.f32 %v1136_v14, 0.0  ;;  %v1151_v19 = vadd.f32 %v1478_v15, %v1364_v61 }
 0x273   : > { %v1145_v20 = vpop.f32.mrf.mxu0  ;;  %v1182_v34 = vrot.slane %v1181_v21, 1 }
 0x274   : > { %v1191_v22 = vadd.f32 %v1190_v17, %v1167_v13  ;;  %v1184_v23 = vrot.slane %v1166_v18, 4  ;;  %v1169_v24 = vmax.f32 %v1151_v19, 0.0  ;;  %v1146_v25 = vadd.f32 %v1364_v61, %v1145_v20 }
 0x275   : > { %v1481_v26 = vpop.f32.mrf.mxu0  ;;  %v1176_v27 = vrot.slane %v1175_v16, 1  ;;  %v1183_v47 = vadd.f32 %v1182_v34, %v1181_v21 }
 0x276   : > { %v1192_v28 = vrot.slane %v1191_v22, 2  ;;  %v1185_v29 = vadd.f32 %v1184_v23, %v1166_v18  ;;  %v1202_v30 = vrot.slane %v1169_v24, 4  ;;  %v1168_v31 = vmax.f32 %v1146_v25, 0.0 }
 0x277   : > { %v1161_v32 = vadd.f32 %v1481_v26, %v1364_v61  ;;  %v1155_v33 = vpop.f32.mrf.mxu0  ;;  %v1177_v41 = vadd.f32 %v1176_v27, %v1175_v16  ;;  %v1221_v60 = vmul.f32 0.125, %v1183_v47 }
 0x278   : > { %v1193_v35 = vadd.f32 %v1192_v28, %v1191_v22  ;;  %v1186_v36 = vrot.slane %v1185_v29, 2  ;;  %v1156_v37 = vadd.f32 %v1364_v61, %v1155_v33  ;;  %v1203_v38 = vadd.f32 %v1202_v30, %v1169_v24 }
 0x279   : > { %v1196_v39 = vrot.slane %v1168_v31, 4  ;;  %v1171_v40 = vmax.f32 %v1161_v32, 0.0  ;;  %v1220_v54 = vmul.f32 0.125, %v1177_v41 }
 0x27a   : > { %v1187_v42 = vadd.f32 %v1186_v36, %v1185_v29  ;;  %v1170_v43 = vmax.f32 %v1156_v37, 0.0  ;;  %v1204_v44 = vrot.slane %v1203_v38, 2  ;;  %v1194_v48 = vrot.slane %v1193_v35, 1 }
 0x27b   : > { %v1197_v45 = vadd.f32 %v1196_v39, %v1168_v31  ;;  %v1214_v46 = vrot.slane %v1171_v40, 4  ;;  %v1237_v2 = vsel %vm1236_vm5, %v1221_v60, %v1220_v54 }
 0x27c   : > { %v1188_v49 = vrot.slane %v1187_v42, 1  ;;  %v1208_v50 = vrot.slane %v1170_v43, 4  ;;  %v1205_v51 = vadd.f32 %v1204_v44, %v1203_v38  ;;  %v1195_v61 = vadd.f32 %v1194_v48, %v1193_v35 }
 0x27d   : > { %v1198_v52 = vrot.slane %v1197_v45, 2  ;;  %v1215_v53 = vadd.f32 %v1214_v46, %v1171_v40 }
 0x27e   : > { %v1189_v55 = vadd.f32 %v1188_v49, %v1187_v42  ;;  %v1209_v56 = vadd.f32 %v1208_v50, %v1170_v43  ;;  %v1206_v57 = vrot.slane %v1205_v51, 1  ;;  %v1223_v8 = vmul.f32 0.125, %v1195_v61 }
 0x27f   : > { %v1199_v58 = vadd.f32 %v1198_v52, %v1197_v45  ;;  %v1216_v59 = vrot.slane %v1215_v53, 2 }
 0x280   : > { %v1222_v62 = vmul.f32 0.125, %v1189_v55  ;;  %v1210_v63 = vrot.slane %v1209_v56, 2  ;;  %v1207_v5 = vadd.f32 %v1206_v57, %v1205_v51 }
 0x281   : > { %v1200_v0 = vrot.slane %v1199_v58, 1  ;;  %v1217_v1 = vadd.f32 %v1216_v59, %v1215_v53 }
 0x282   : > { %v1211_v3 = vadd.f32 %v1210_v63, %v1209_v56  ;;  %v1239_v4 = vsel %vm1238_vm6, %v1222_v62, %v1237_v2  ;;  %v1225_v14 = vmul.f32 0.125, %v1207_v5 }
 0x283   : > { %v1201_v6 = vadd.f32 %v1200_v0, %v1199_v58  ;;  %v1218_v7 = vrot.slane %v1217_v1, 1  ;;  %v1241_v13 = vsel %vm1240_vm7, %v1223_v8, %v1239_v4 }
 0x284   : > { %v1212_v9 = vrot.slane %v1211_v3, 1 }
 0x285   : > { %v1224_v10 = vmul.f32 0.125, %v1201_v6  ;;  %v1219_v11 = vadd.f32 %v1218_v7, %v1217_v1 }
 0x286   : > { %v1213_v12 = vadd.f32 %v1212_v9, %v1211_v3 }
 0x287   : > { %v1243_v15 = vsel %vm1242_vm8, %v1224_v10, %v1241_v13  ;;  %v1227_v17 = vmul.f32 0.125, %v1219_v11 }
 0x288   : > { %v1226_v16 = vmul.f32 0.125, %v1213_v12  ;;  %v1245_v18 = vsel %vm1244_vm9, %v1225_v14, %v1243_v15 }
 0x28a   : > { %v1247_v19 = vsel %vm1246_vm10, %v1226_v16, %v1245_v18 }
 0x28b   : > { %v1249_v20 = vsel %vm1248_vm11, %v1227_v17, %v1247_v19 }
 0x28c   : > { %1251 = vst [vmem:[%s261_s15] sm:$0xff] %v1249_v20 }
 0x28d   : > { %1538 = shalt.err (!%p1535_p3)
}
 0x28e   : > { %s1539_s9 = scalar_lea.hbm %s1766_s19, 128  ;;  %s1543_s12 = scalar_lea.hbm %s1809_s6, 256 }
 0x28f   : > { %p1540_p4 = scmp.ne.s32.totalorder %s1766_s19, %s1539_s9  ;;  %p1544_p9 = scmp.lt.s32.totalorder %s1766_s19, %s1809_s6 }
 0x290   : > { %p1545_p10 = scmp.lt.s32.totalorder %s1543_s12, %s1539_s9 }
 0x291   : > { %p1541_p7 = pnand %p1540_p4, %p1663_p5 }
 0x292   : > { %p1546_p11 = por %p1545_p10, %p1544_p9 }
 0x293   : > { %p1542_p8 = pneg %p1541_p7 }
 0x295   : > { %p1547_p12 = pnand %p1546_p11, %p1542_p8 }
 0x297   : > { %1550 = shalt.err (!%p1547_p12)
}
 0x298   : > { %1484 = dma.vmem_to_hbm [thread:$0]  (%p1663_p5), %s1267_s16, 128, %s1766_s19, %s1253_s20  }
 0x299 PF: > { %p1490_p13 = scmp.ge.s32.totalorder %s1585_s24, 2  ;;  %s1278_s15 = sand.u32 1, %s1573_s21  }
 0x29a   : > { %s1279_s17 = scalar_lea.sflag [#allocation3], %s1278_s15 }
 0x29b   : > { %p1487_p0 = pnand %p1490_p13, %p1667_p6 }
 0x29d   : > { %p1488_p1 = pneg %p1487_p0 }
 0x29f   : > { %1568 = dma.done.wait (%p1488_p1), %s1279_s17, 128  }
 0x2a0   : > { %1570 = vsyncadd (%p1488_p1), %s1279_s17, 4294967168  ;;  %p16_p2 = scmp.ge.s32.totalorder %s1650_s27, 4   ;;  %s1812_s21 = smov %s1577_s22 }
 0x2a1   : > { %s1813_s22 = smov %s1581_s23  ;;  %s1814_s23 = smov %s1661_s30 }
 0x2a2   : > { %s1815_s24 = smov %s1650_s27  ;;  %18 = sbr.rel (!%p16_p2) target bundleno = 3 (0x3), region = 82 }
 0x2a7   :  { %1284 = vsyncpa [#allocation3], 1 }
 0x2a8   :  { %1286 = vsyncpa [#allocation3 + $0x1], 1 }

</bundles_post_ra>
